<compile_context>
chip_gen: v7x
topology: tpu7x:2x2x1
jax: 0.10.0
libtpu: 0.0.40
codegen_flags: <defaults>
</compile_context>

<pallas_src>
import numpy as np
import jax
import jax.numpy as jnp
from jax.experimental import pallas as pl
from jax.experimental.pallas import tpu as pltpu


# ---------------------------------------------------------------------------
# Interpolation-matrix construction (host-side glue; exact PyTorch semantics)
# ---------------------------------------------------------------------------
def _adaptive_pool_matrix(in_size: int, out_size: int) -> np.ndarray:
    """1-D adaptive average pool as a matrix: pooled = P @ x (PyTorch semantics)."""
    P = np.zeros((out_size, in_size), dtype=np.float32)
    for o in range(out_size):
        start = (o * in_size) // out_size
        end = -((-(o + 1) * in_size) // out_size)  # ceil((o+1)*in/out)
        P[o, start:end] = 1.0 / (end - start)
    return P


def _bilinear_upsample_matrix(out_size: int, in_size: int) -> np.ndarray:
    """1-D bilinear upsample (align_corners=True) as a matrix: out = U @ small."""
    U = np.zeros((out_size, in_size), dtype=np.float32)
    for o in range(out_size):
        if in_size == 1 or out_size == 1:
            src = 0.0
        else:
            src = o * (in_size - 1) / (out_size - 1)
        i0 = min(int(np.floor(src)), in_size - 1)
        i1 = min(i0 + 1, in_size - 1)
        frac = src - i0
        U[o, i0] += 1.0 - frac
        U[o, i1] += frac
    return U


def _invariant_spec(block_shape, index_map):
    """BlockSpec for a grid-invariant operand: single-buffered (the block index is
    constant, so the default double-buffering only wastes VMEM)."""
    try:
        return pl.BlockSpec(block_shape, index_map, pipeline_mode=pl.Buffered(1))
    except (TypeError, AttributeError):   # older jax without pipeline_mode
        return pl.BlockSpec(block_shape, index_map)


# ---------------------------------------------------------------------------
# Pass 1: pooled-space reduction over HW tiles + folded stage 1x1 convs -> z
# ---------------------------------------------------------------------------
def _make_pool_kernel(stage_slices):
    s_tot = stage_slices[-1][0] + stage_slices[-1][1]

    def pool_kernel(x_ref, pt_ref, wfold_ref, z_ref, pooled_acc):
        # x_ref      : (1, C, HW_TILE)   bf16  channels-first image tile
        # pt_ref     : (HW_TILE, S_pad)  bf16  stacked adaptive-avg-pool operator tile
        # wfold_ref  : (n_stages, F, C)  bf16  bottleneck_chunk_s @ stage_conv_s
        # z_ref      : (1, F, S_pad)     bf16  per-image pooled-space features (out)
        # pooled_acc : (C, S_pad)        f32   VMEM accumulator over HW tiles
        t = pl.program_id(1)

        @pl.when(t == 0)
        def _():
            pooled_acc[...] = jnp.zeros_like(pooled_acc)

        # spatial adaptive-avg-pool of all pyramid stages as one stacked matmul
        pooled_acc[...] += jnp.dot(x_ref[0], pt_ref[...],
                                   preferred_element_type=jnp.float32)

        @pl.when(t == pl.num_programs(1) - 1)
        def _():
            pooled = pooled_acc[...]                         # (C, S_pad) f32
            f_out = z_ref.shape[1]
            s_pad = z_ref.shape[2]
            # folded (stage conv ∘ bottleneck chunk) on each stage's pooled bins:
            # static column slices, f32 through the tiny matmuls (accuracy), then
            # stitched back together + explicit zero tail for the S padding.
            parts = []
            for s, (off, width) in enumerate(stage_slices):
                parts.append(jnp.dot(wfold_ref[s].astype(jnp.float32),
                                     pooled[:, off:off + width],
                                     preferred_element_type=jnp.float32))
            if s_pad > s_tot:
                parts.append(jnp.zeros((f_out, s_pad - s_tot), jnp.float32))
            z_ref[0] = jnp.concatenate(parts, axis=-1).astype(z_ref.dtype)

    return pool_kernel


# ---------------------------------------------------------------------------
# Pass 2: per-HW-tile  out = relu(wid @ x + z @ UT + bias)   (bf16 output)
# ---------------------------------------------------------------------------
def psp_out_kernel(x_ref, z_ref, ut_ref, wid_ref, bias_ref, o_ref):
    # x_ref   : (1, C, HW_TILE)  bf16
    # z_ref   : (1, F, S_pad)    bf16  pooled-space features for this image
    # ut_ref  : (S_pad, HW_TILE) bf16  stacked bilinear-upsample operator tile
    # wid_ref : (F, C)           bf16  identity-branch bottleneck chunk
    # bias_ref: (F, 1)           f32
    # o_ref   : (1, F, HW_TILE)  bf16  lane-dense output tile
    acc = jnp.dot(wid_ref[...], x_ref[0], preferred_element_type=jnp.float32)
    acc = acc + jnp.dot(z_ref[0], ut_ref[...], preferred_element_type=jnp.float32)
    # bias + ReLU in f32, single cast at the store
    o_ref[0] = jnp.maximum(acc + bias_ref[...], 0.0).astype(o_ref.dtype)


# ---------------------------------------------------------------------------
# Wrapper
# ---------------------------------------------------------------------------
def psp_forward(x_nchw, stage_weights, bottleneck_w, bottleneck_b,
                sizes=(1, 2, 3, 6), compute_dtype=jnp.bfloat16, hw_tile=512):
    N, C, H, W = x_nchw.shape
    F_out = bottleneck_b.shape[0]
    HW = H * W
    n_stages = len(sizes)
    s_tot = sum(s * s for s in sizes)
    S_pad = ((s_tot + 15) // 16) * 16          # bf16-friendly padding (56 -> 64)

    # HW tiling: lane-dense tiles (multiple of 128), HW zero-padded to a tile multiple.
    hw_tile = max(128, (hw_tile // 128) * 128)
    hw_tile = min(hw_tile, -(-HW // 128) * 128)
    HW_pad = -(-HW // hw_tile) * hw_tile
    n_tiles = HW_pad // hw_tile

    # Stacked pooling / upsample operators (padded regions are exactly zero).
    PT = np.zeros((HW_pad, S_pad), np.float32)          # pooled = x_cf @ PT
    UT = np.zeros((S_pad, HW_pad), np.float32)          # up     = z @ UT
    stage_slices = []
    off = 0
    for s in sizes:
        Pi = np.kron(_adaptive_pool_matrix(H, s), _adaptive_pool_matrix(W, s))          # (s^2, HW)
        Ui = np.kron(_bilinear_upsample_matrix(H, s), _bilinear_upsample_matrix(W, s))  # (HW, s^2)
        PT[:HW, off:off + s * s] = Pi.T
        UT[off:off + s * s, :HW] = Ui.T
        stage_slices.append((off, s * s))
        off += s * s
    stage_slices = tuple(stage_slices)

    # Fold each stage's 1x1 conv into its bottleneck chunk (host side, f32).
    bw2 = jnp.reshape(bottleneck_w, (F_out, (n_stages + 1) * C)).astype(jnp.float32)
    wfold = jnp.stack([
        bw2[:, s * C:(s + 1) * C] @ jnp.reshape(stage_weights[s], (C, C)).astype(jnp.float32)
        for s in range(n_stages)
    ])                                                   # (n_stages, F, C)
    wid = bw2[:, n_stages * C:]                          # (F, C) identity-branch chunk
    bias = jnp.reshape(bottleneck_b, (F_out, 1)).astype(jnp.float32)

    # NCHW -> (N, C, HW) is a pure reshape; zero-pad HW (padded columns contribute 0).
    x = jnp.reshape(x_nchw, (N, C, HW)).astype(compute_dtype)
    if HW_pad != HW:
        x = jnp.pad(x, ((0, 0), (0, 0), (0, HW_pad - HW)))

    pt = jnp.asarray(PT, dtype=compute_dtype)
    ut = jnp.asarray(UT, dtype=compute_dtype)
    wfold_c = wfold.astype(compute_dtype)
    wid_c = wid.astype(compute_dtype)

    vmem_limit = 48 * 1024 * 1024   # fits v7x's 64 MiB with DMA headroom; fine on 128 MiB parts

    # ---- pass 1: pooled accumulation over HW tiles + folded stage convs -> z ----
    pool_cost = pl.CostEstimate(
        flops=int(2 * N * C * S_pad * HW_pad + 2 * N * F_out * C * s_tot),
        transcendentals=0,
        bytes_accessed=int(x.size * 2 + pt.size * 2 + wfold_c.size * 2
                           + N * F_out * S_pad * 2))
    z = pl.pallas_call(
        _make_pool_kernel(stage_slices),
        out_shape=jax.ShapeDtypeStruct((N, F_out, S_pad), compute_dtype),
        grid=(N, n_tiles),
        in_specs=[
            pl.BlockSpec((1, C, hw_tile), lambda b, t: (b, 0, t)),
            pl.BlockSpec((hw_tile, S_pad), lambda b, t: (t, 0)),
            _invariant_spec((n_stages, F_out, C), lambda b, t: (0, 0, 0)),
        ],
        out_specs=pl.BlockSpec((1, F_out, S_pad), lambda b, t: (b, 0, 0)),
        scratch_shapes=[pltpu.VMEM((C, S_pad), jnp.float32)],
        compiler_params=pltpu.CompilerParams(
            dimension_semantics=("parallel", "arbitrary"),   # HW-tile axis is a reduction
            vmem_limit_bytes=vmem_limit),
        cost_estimate=pool_cost,
    )(x, pt, wfold_c)

    # ---- pass 2: per-HW-tile relu(wid @ x + z @ UT + bias), bf16 output ----
    out_cost = pl.CostEstimate(
        flops=int(2 * N * F_out * (C + S_pad) * HW_pad),
        transcendentals=0,
        bytes_accessed=int(x.size * 2 + ut.size * 2 + wid_c.size * 2 + z.size * 2
                           + bias.size * 4 + N * F_out * HW_pad * 2))
    out = pl.pallas_call(
        psp_out_kernel,
        out_shape=jax.ShapeDtypeStruct((N, F_out, HW_pad), compute_dtype),
        grid=(N, n_tiles),
        in_specs=[
            pl.BlockSpec((1, C, hw_tile), lambda b, t: (b, 0, t)),
            pl.BlockSpec((1, F_out, S_pad), lambda b, t: (b, 0, 0)),
            pl.BlockSpec((S_pad, hw_tile), lambda b, t: (0, t)),
            _invariant_spec((F_out, C), lambda b, t: (0, 0)),
            _invariant_spec((F_out, 1), lambda b, t: (0, 0)),
        ],
        out_specs=pl.BlockSpec((1, F_out, hw_tile), lambda b, t: (b, 0, t)),
        compiler_params=pltpu.CompilerParams(
            dimension_semantics=("parallel", "parallel"),   # >=2 parallel units (v7x dual TC)
            vmem_limit_bytes=vmem_limit),
        cost_estimate=out_cost,
    )(x, z, ut, wid_c, bias)

    if HW_pad != HW:
        out = out[:, :, :HW]
    # (N, F, HW) -> NCHW is a pure reshape.
    return jnp.reshape(out, (N, F_out, H, W))


# Pure-JAX f32 reference (unfused, same math as the PyTorch module) for a sanity check.
def psp_reference(x_nchw, stage_weights, bottleneck_w, bottleneck_b, sizes=(1, 2, 3, 6)):
    N, C, H, W = x_nchw.shape
    F_out = bottleneck_b.shape[0]
    HW = H * W
    x = jnp.transpose(x_nchw, (0, 2, 3, 1)).reshape(N, HW, C).astype(jnp.float32)
    n_stages = len(sizes)
    bw2 = jnp.reshape(bottleneck_w, (F_out, (n_stages + 1) * C))
    acc = jnp.einsum("nqc,fc->nqf", x, bw2[:, n_stages * C:])
    for i, s in enumerate(sizes):
        P2d = jnp.asarray(np.kron(_adaptive_pool_matrix(H, s), _adaptive_pool_matrix(W, s)))
        U2d = jnp.asarray(np.kron(_bilinear_upsample_matrix(H, s), _bilinear_upsample_matrix(W, s)))
        pooled = jnp.einsum("pq,nqc->npc", P2d, x)
        conv = jnp.einsum("npc,oc->npo", pooled, jnp.reshape(stage_weights[i], (C, C)))
        up = jnp.einsum("qp,npc->nqc", U2d, conv)
        acc = acc + jnp.einsum("nqc,fc->nqf", up, bw2[:, i * C:(i + 1) * C])
    out = jax.nn.relu(acc + bottleneck_b[None, None, :])
    return jnp.transpose(out.reshape(N, H, W, F_out), (0, 3, 1, 2))


if __name__ == "__main__":
    # Small shapes consistent with PSPModule(features=4, out_features=8)
    N, C, H, W = 2, 4, 16, 16
    F_out = 8
    sizes = (1, 2, 3, 6)

    key = jax.random.PRNGKey(0)
    kx, *kw = jax.random.split(key, 2 + len(sizes) + 2)
    x = jax.random.normal(kx, (N, C, H, W), dtype=jnp.float32)

    # Synthetic parameters (shapes from __init__):
    #   per-stage 1x1 conv (C, C) no bias; bottleneck conv (F, 5C) + bias (F,)
    stage_weights = [0.3 * jax.random.normal(kw[i], (C, C), dtype=jnp.float32)
                     for i in range(len(sizes))]
    bottleneck_w = 0.2 * jax.random.normal(kw[len(sizes)], (F_out, (len(sizes) + 1) * C),
                                           dtype=jnp.float32)
    bottleneck_b = 0.1 * jax.random.normal(kw[len(sizes) + 1], (F_out,), dtype=jnp.float32)

    # hw_tile=128 -> 2 HW tiles at this demo size, exercising the reduction pipeline.
    out = psp_forward(x, stage_weights, bottleneck_w, bottleneck_b, sizes, hw_tile=128)
    out = jax.block_until_ready(out)

    ref = jax.block_until_ready(psp_reference(x, stage_weights, bottleneck_w, bottleneck_b, sizes))
    assert out.shape == (N, F_out, H, W)
    # bf16 inputs / operators / output with f32 accumulation -> compare at 3e-2.
    np.testing.assert_allclose(np.asarray(out, dtype=np.float32), np.asarray(ref),
                               rtol=3e-2, atol=3e-2)

    print("KERNEL_OK")
</pallas_src>

<mosaic_0001>
module attributes {stable_mosaic.version = 11 : i64} {
  func.func @pool_kernel(%arg0: i32, %arg1: i32, %arg2: memref<1x4x128xbf16, #tpu.memory_space<vmem>>, %arg3: memref<128x64xbf16, #tpu.memory_space<vmem>>, %arg4: memref<4x8x4xbf16, #tpu.memory_space<vmem>>, %arg5: memref<1x8x64xbf16, #tpu.memory_space<vmem>>, %arg6: memref<4x64xf32, #tpu.memory_space<vmem>>) attributes {dimension_semantics = [#tpu.dimension_semantics<parallel>, #tpu.dimension_semantics<arbitrary>], iteration_bounds = array<i64: 2, 2>, scalar_prefetch = 0 : i64, scratch_operands = 1 : i64, tpu.core_type = #tpu.core_type<tc>, window_params = [{transform_indices = @transform_0, window_bounds = array<i64: 1, 4, 128>}, {transform_indices = @transform_1, window_bounds = array<i64: 128, 64>}, {pipeline_mode = #tpu.pipeline_mode<synchronous>, transform_indices = @transform_2, window_bounds = array<i64: 4, 8, 4>}, {transform_indices = @transform_3, window_bounds = array<i64: 1, 8, 64>}]} {
    %c0_i32 = arith.constant 0 : i32
    %0 = arith.cmpi eq, %arg1, %c0_i32 : i32
    %1 = arith.extui %0 : i1 to i32
    %c0_i32_0 = arith.constant 0 : i32
    %2 = arith.cmpi ne, %1, %c0_i32_0 : i32
    scf.if %2 {
      %cst_10 = arith.constant 0.000000e+00 : f32
      %13 = vector.broadcast %cst_10 : f32 to vector<4x64xf32>
      %c0_11 = arith.constant 0 : index
      %c0_12 = arith.constant 0 : index
      %14 = vector.load %arg6[%c0_11, %c0_12] : memref<4x64xf32, #tpu.memory_space<vmem>>, vector<4x64xf32>
      tpu.vector_store %arg6[%c0_11, %c0_12], %13 {strides = array<i32>} : memref<4x64xf32, #tpu.memory_space<vmem>>, vector<4x64xf32>,
    } else {
    }
    %c0 = arith.constant 0 : index
    %c0_1 = arith.constant 0 : index
    %3 = vector.load %arg6[%c0, %c0_1] : memref<4x64xf32, #tpu.memory_space<vmem>>, vector<4x64xf32>
    %c0_2 = arith.constant 0 : index
    %c0_3 = arith.constant 0 : index
    %c0_4 = arith.constant 0 : index
    %4 = vector.load %arg2[%c0_2, %c0_3, %c0_4] : memref<1x4x128xbf16, #tpu.memory_space<vmem>>, vector<1x4x128xbf16>
    %5 = vector.shape_cast %4 : vector<1x4x128xbf16> to vector<4x128xbf16>
    %c0_5 = arith.constant 0 : index
    %c0_6 = arith.constant 0 : index
    %6 = vector.load %arg3[%c0_5, %c0_6] : memref<128x64xbf16, #tpu.memory_space<vmem>>, vector<128x64xbf16>
    %cst = arith.constant dense<0.000000e+00> : vector<4x64xf32>
    %7 = tpu.matmul %5, %6, %cst {dimension_numbers = #tpu.dot_dimension_numbers<[1], [0], [0], [1], [0, 0, 1, 1], [], []>} : vector<4x128xbf16>, vector<128x64xbf16>, vector<4x64xf32> -> vector<4x64xf32>
    %8 = arith.addf %3, %7 : vector<4x64xf32>
    %c0_7 = arith.constant 0 : index
    %c0_8 = arith.constant 0 : index
    %9 = vector.load %arg6[%c0_7, %c0_8] : memref<4x64xf32, #tpu.memory_space<vmem>>, vector<4x64xf32>
    tpu.vector_store %arg6[%c0_7, %c0_8], %8 {strides = array<i32>} : memref<4x64xf32, #tpu.memory_space<vmem>>, vector<4x64xf32>,
    %c1_i32 = arith.constant 1 : i32
    %10 = arith.cmpi eq, %arg1, %c1_i32 : i32
    %11 = arith.extui %10 : i1 to i32
    %c0_i32_9 = arith.constant 0 : i32
    %12 = arith.cmpi ne, %11, %c0_i32_9 : i32
    scf.if %12 {
      %c0_10 = arith.constant 0 : index
      %c0_11 = arith.constant 0 : index
      %13 = vector.load %arg6[%c0_10, %c0_11] : memref<4x64xf32, #tpu.memory_space<vmem>>, vector<4x64xf32>
      %c0_12 = arith.constant 0 : index
      %c0_13 = arith.constant 0 : index
      %c0_14 = arith.constant 0 : index
      %14 = vector.load %arg4[%c0_12, %c0_13, %c0_14] : memref<4x8x4xbf16, #tpu.memory_space<vmem>>, vector<1x8x4xbf16>
      %15 = vector.shape_cast %14 : vector<1x8x4xbf16> to vector<8x4xbf16>
      %16 = arith.extf %15 : vector<8x4xbf16> to vector<8x4xf32>
      %17 = vector.extract_strided_slice %13 {offsets = [0, 0], sizes = [4, 1], strides = [1, 1]} : vector<4x64xf32> to vector<4x1xf32>
      %cst_15 = arith.constant dense<0.000000e+00> : vector<8x1xf32>
      %18 = tpu.matmul %16, %17, %cst_15 {dimension_numbers = #tpu.dot_dimension_numbers<[1], [0], [0], [1], [0, 0, 1, 1], [], []>} : vector<8x4xf32>, vector<4x1xf32>, vector<8x1xf32> -> vector<8x1xf32>
      %c1 = arith.constant 1 : index
      %c0_16 = arith.constant 0 : index
      %c0_17 = arith.constant 0 : index
      %19 = vector.load %arg4[%c1, %c0_16, %c0_17] : memref<4x8x4xbf16, #tpu.memory_space<vmem>>, vector<1x8x4xbf16>
      %20 = vector.shape_cast %19 : vector<1x8x4xbf16> to vector<8x4xbf16>
      %21 = arith.extf %20 : vector<8x4xbf16> to vector<8x4xf32>
      %22 = vector.extract_strided_slice %13 {offsets = [0, 1], sizes = [4, 4], strides = [1, 1]} : vector<4x64xf32> to vector<4x4xf32>
      %cst_18 = arith.constant dense<0.000000e+00> : vector<8x4xf32>
      %23 = tpu.matmul %21, %22, %cst_18 {dimension_numbers = #tpu.dot_dimension_numbers<[1], [0], [0], [1], [0, 0, 1, 1], [], []>} : vector<8x4xf32>, vector<4x4xf32>, vector<8x4xf32> -> vector<8x4xf32>
      %c2 = arith.constant 2 : index
      %c0_19 = arith.constant 0 : index
      %c0_20 = arith.constant 0 : index
      %24 = vector.load %arg4[%c2, %c0_19, %c0_20] : memref<4x8x4xbf16, #tpu.memory_space<vmem>>, vector<1x8x4xbf16>
      %25 = vector.shape_cast %24 : vector<1x8x4xbf16> to vector<8x4xbf16>
      %26 = arith.extf %25 : vector<8x4xbf16> to vector<8x4xf32>
      %27 = vector.extract_strided_slice %13 {offsets = [0, 5], sizes = [4, 9], strides = [1, 1]} : vector<4x64xf32> to vector<4x9xf32>
      %cst_21 = arith.constant dense<0.000000e+00> : vector<8x9xf32>
      %28 = tpu.matmul %26, %27, %cst_21 {dimension_numbers = #tpu.dot_dimension_numbers<[1], [0], [0], [1], [0, 0, 1, 1], [], []>} : vector<8x4xf32>, vector<4x9xf32>, vector<8x9xf32> -> vector<8x9xf32>
      %c3 = arith.constant 3 : index
      %c0_22 = arith.constant 0 : index
      %c0_23 = arith.constant 0 : index
      %29 = vector.load %arg4[%c3, %c0_22, %c0_23] : memref<4x8x4xbf16, #tpu.memory_space<vmem>>, vector<1x8x4xbf16>
      %30 = vector.shape_cast %29 : vector<1x8x4xbf16> to vector<8x4xbf16>
      %31 = arith.extf %30 : vector<8x4xbf16> to vector<8x4xf32>
      %32 = vector.extract_strided_slice %13 {offsets = [0, 14], sizes = [4, 36], strides = [1, 1]} : vector<4x64xf32> to vector<4x36xf32>
      %cst_24 = arith.constant dense<0.000000e+00> : vector<8x36xf32>
      %33 = tpu.matmul %31, %32, %cst_24 {dimension_numbers = #tpu.dot_dimension_numbers<[1], [0], [0], [1], [0, 0, 1, 1], [], []>} : vector<8x4xf32>, vector<4x36xf32>, vector<8x36xf32> -> vector<8x36xf32>
      %cst_25 = arith.constant 0.000000e+00 : f32
      %34 = vector.broadcast %cst_25 : f32 to vector<8x14xf32>
      %35 = tpu.concatenate %18, %23, %28, %33, %34 in 1 : vector<8x1xf32>, vector<8x4xf32>, vector<8x9xf32>, vector<8x36xf32>, vector<8x14xf32> -> vector<8x64xf32>
      %36 = arith.truncf %35 : vector<8x64xf32> to vector<8x64xbf16>
      %c0_26 = arith.constant 0 : index
      %c0_27 = arith.constant 0 : index
      %c0_28 = arith.constant 0 : index
      %37 = vector.load %arg5[%c0_26, %c0_27, %c0_28] : memref<1x8x64xbf16, #tpu.memory_space<vmem>>, vector<1x8x64xbf16>
      %38 = vector.shape_cast %37 : vector<1x8x64xbf16> to vector<8x64xbf16>
      %39 = vector.shape_cast %36 : vector<8x64xbf16> to vector<1x8x64xbf16>
      tpu.vector_store %arg5[%c0_26, %c0_27, %c0_28], %39 {strides = array<i32>} : memref<1x8x64xbf16, #tpu.memory_space<vmem>>, vector<1x8x64xbf16>,
    } else {
    }
    return
  }
  func.func @transform_0(%arg0: i32, %arg1: i32) -> (i32, i32, i32) {
    %c0_i32 = arith.constant 0 : i32
    %c0_i32_0 = arith.constant 0 : i32
    return %arg0, %c0_i32, %arg1 : i32, i32, i32
  }
  func.func @transform_1(%arg0: i32, %arg1: i32) -> (i32, i32) {
    %c0_i32 = arith.constant 0 : i32
    %c0_i32_0 = arith.constant 0 : i32
    return %arg1, %c0_i32 : i32, i32
  }
  func.func @transform_2(%arg0: i32, %arg1: i32) -> (i32, i32, i32) {
    %c0_i32 = arith.constant 0 : i32
    %c0_i32_0 = arith.constant 0 : i32
    %c0_i32_1 = arith.constant 0 : i32
    %c0_i32_2 = arith.constant 0 : i32
    return %c0_i32, %c0_i32_0, %c0_i32_1 : i32, i32, i32
  }
  func.func @transform_3(%arg0: i32, %arg1: i32) -> (i32, i32, i32) {
    %c0_i32 = arith.constant 0 : i32
    %c0_i32_0 = arith.constant 0 : i32
    %c0_i32_1 = arith.constant 0 : i32
    return %arg0, %c0_i32, %c0_i32_0 : i32, i32, i32
  }
}

</mosaic_0001>

<bundles_post_ra>
// kernel: tpu_custom_call.1
= control target key start
LH: loop header
LB: loop body
LE: loop exit
PB: predicated region body
PF: predicated region fallthrough
CT: control target
= control target key end

     0   :  { %8 = vsyncpa [#allocation4], 0  ;;  %s1267_s0 = inlined_call_operand.vmem [shape: bf16[2,4,256], index: 0, kind: input, shape index: {}]   ;;  %s1268_s1 = inlined_call_operand.vmem [shape: bf16[256,64], index: 1, kind: input, shape index: {}]   ;;  %s1269_s2 = inlined_call_operand.vmem [shape: bf16[4,8,4], index: 2, kind: input, shape index: {}]   ;;  %s1270_s3 = inlined_call_operand.hbm [shape: bf16[2,8,64], index: 3, kind: output, shape index: {}]  }
   0x1   :  { %10 = vsyncpa [#allocation4 + $0x1], 0  ;;  %s1089_s12 = smov 0   ;;  %s1091_s13 = smov 0  }
   0x2   :  { %s1093_s14 = smov 0   ;;  %s1095_s15 = smov 0  }
   0x3   :  { %s1097_s16 = smov 0   ;;  %s1099_s17 = smov 0  }
   0x4   :  { %s1101_s18 = smov 0   ;;  %s1103_s19 = smov 0  }
   0x5 LB: > { %s779_s20 = sadd.s32 4294967295, %s1055_s19   ;;  %s780_s21 = sadd.s32 4294967294, %s1055_s19   ;;  %s1055_s19 = sphi %s1103_s19, %s16_s19   ;;  %s1051_s18 = sphi %s1101_s18, %s1284_s18   ;;  %s1047_s17 = sphi %s1099_s17, %s1283_s17   ;;  %s1043_s16 = sphi %s1097_s16, %s1282_s16   ;;  %s1039_s15 = sphi %s1095_s15, %s1281_s15   ;;  %s1035_s14 = sphi %s1093_s14, %s1280_s14   ;;  %s1031_s13 = sphi %s1091_s13, %s1279_s13   ;;  %s1027_s12 = sphi %s1089_s12, %s1278_s12  }
   0x6   : > { %s25_s22 = sadd.s32 1, %s1047_s17  ;;  %s28_s23 = sadd.s32 1, %s1051_s18 }
   0x7   : > { %p26_p0 = scmp.ge.s32.totalorder %s25_s22, 2  ;;  %p120_p1 = scmp.ne.s32.totalorder %s1035_s14, %s1031_s13 }
   0x8   : > { %p121_p2 = scmp.eq.s32.totalorder %s779_s20, 3  ;;  %p126_p4 = scmp.ne.s32.totalorder %s1031_s13, %s1027_s12 }
   0x9   : > { %s1286_s22 = smov (%p26_p0, %s25_s22), 0  ;;  %s1288_s23 = smov (!%p26_p0, %s28_s23), %s1051_s18 }
   0xa   : > { %p1138_p3 = por %p121_p2, %p120_p1  ;;  %p30_p5 = scmp.ge.s32.totalorder %s1288_s23, 2 }
   0xb   : > { %p127_p6 = scmp.eq.s32.totalorder %s780_s21, 3  ;;  %p783_p7 = scmp.ge.s32.totalorder %s1055_s19, 1 }
   0xc   : > { %p168_p8 = scmp.lt.s32.totalorder %s1055_s19, 5  ;;  %s1290_s23 = smov (%p30_p5, %s1288_s23), 0 }
   0xd   : > { %1274 = sst [smem:[#allocation6_spill]] %s1290_s23  ;;  %p1148_p9 = por %p127_p6, %p126_p4 }
   0xe   : > { %p169_p10 = pnand %p783_p7, %p168_p8  ;;  %s107_s26 = ssub.s32 %s1051_s18, %s1290_s23 }
   0xf   : > { %s110_s27 = sadd.s32 1, %s1035_s14  ;;  %p108_p11 = scmp.eq.s32.totalorder %s107_s26, 0 }
  0x10   : > { %172 = sbr.rel (%p169_p10) target bundleno = 768 (0x300), region = 32  ;;  %s1271_s29 = sand.u32 (!%p169_p10), 1, %s1031_s13  }
  0x11   : > { %s1156_s28 = scalar_select %p108_p11, %s1035_s14, %s110_s27  }
  0x12   : > { %p200_p12 = scmp.lt.s32.totalorder (!%p169_p10), %s1043_s16, 1  ;;  %s1162_s30 = sshll.u32 (!%p169_p10), %s1271_s29, 2 }
  0x13   : > { %p202_p13 = scmp.lt.s32.totalorder (!%p169_p10), %s1039_s15, 1  ;;  %s787_s4 = sshll.u32 (!%p169_p10), %s1039_s15, 4 }
  0x14   : > { %p209_p0 = scmp.lt.s32.totalorder (!%p169_p10), %s787_s4, 31  ;;  %s199_s23 = scalar_lea.vmem (!%p169_p10), [#allocation3], %s1162_s30 }
  0x15   : > { %p789_p1 = scmp.ne.s32.totalorder (!%p169_p10), %s1039_s15, 0 }
  0x17   : > { %s201_s5 = scalar_select %p200_p12, %s1043_s16, 1 }
  0x18   : > { %s203_s6 = scalar_select %p202_p13, %s1039_s15, 1 }
  0x19   : > { %s785_s7 = sshll.u32 %s201_s5, 1  ;;  %s1292_s4 = smov (!%p209_p0, %s787_s4), 31  ;;  %vm219_vm0 = vcmask (!%p789_p1), 519168   ;;  %v1057_v0 = vmov (!%p789_p1), 0.0  }
  0x1a   : > { %s205_s8 = sadd.s32 %s785_s7, %s203_s6  ;;  %s788_s21 = sshll.u32 %s1292_s4, 2  ;;  %220 = vst.msk [vmem:[#allocation2] sm:$0xf] (!%p789_p1), %vm219_vm0, %v1057_v0 }
  0x1b   : > { %s786_s9 = sshll.u32 %s205_s8, 1  ;;  %s1176_s29 = scalar_lea.vmem %s1268_s1, %s788_s21 }
  0x1c   : > { %s1171_s20 = scalar_lea.vmem %s1267_s0, %s786_s9  ;;  %218 = sbr.rel (%p789_p1) target bundleno = 35 (0x23), region = 36 }
  0x23 PF: > { %v953_v1 = vld [vmem:[%s1176_s29] sm:$0xff]   ;;  %v1058_v2 = vmov 0.0   ;;  %v954_v3 = vld [vmem:[%s1176_s29 + $0x8] sm:$0xff]   ;;  %vm1059_vm1 = vmmov 0   ;;  %v955_v4 = vld [vmem:[%s1176_s29 + $0x10] sm:$0xff]   ;;  %vm328_vm2 = vcmask 519168  }
  0x24   : > { %831 = vmatprep.subr.bf16.mxu0 %v1058_v2  ;;  %847 = vmatprep.mubr.msk.bf16.mxu0 %vm1059_vm1, %v1058_v2  ;;  %v956_v5 = vld [vmem:[%s1176_s29 + $0x18] sm:$0xff]   ;;  %v957_v6 = vld [vmem:[%s1176_s29 + $0x20] sm:$0xff]   ;;  %v958_v7 = vld [vmem:[%s1176_s29 + $0x28] sm:$0xff]   ;;  %p798_p2 = scmp.ne.s32.totalorder %s1039_s15, 1 }
  0x25   : > { %832 = vmatpush3.bf16.msra.mxu0 %v953_v1  ;;  %v959_v8 = vld [vmem:[%s1176_s29 + $0x30] sm:$0xff]   ;;  %v960_v9 = vld [vmem:[%s1176_s29 + $0x38] sm:$0xff]   ;;  %v222_v10 = vld [vmem:[%s1171_s20] sm:$0x3]  ;;  %vm341_vm3 = vcmask (!%p798_p2), 1043456   ;;  %s1060_s4 = smov (!%p798_p2), 127  }
  0x26   : > { %833 = vmatprep.subr.bf16.mxu0 %v1058_v2  ;;  %v221_v11 = vld [vmem:[#allocation2] sm:$0xf]  ;;  %v1061_v18 = vmov (!%p798_p2), 0.0   ;;  %vm337_vm4 = vcmask (!%p798_p2), 31744   ;;  %s1062_s6 = smov (!%p798_p2), 114   ;;  %vm1063_vm5 = vmmov (!%p798_p2), 0  }
  0x27   : > { %v335_v19 = vld [vmem:[%s1269_s2] sm:$0xff] (!%p798_p2)   ;;  %856 = vmatprep.subr.mxu1 (!%p798_p2), %v1061_v18  ;;  %858 = vmatprep.mubr.msk.f32.mxu1 (!%p798_p2), %vm1063_vm5, %v1061_v18  ;;  %s1064_s15 = smov (!%p798_p2), 123   ;;  %v804_v22 = vld [vmem:[%s1269_s2 + $0x8] sm:$0xff] (!%p798_p2)   ;;  %s1065_s9 = smov (!%p798_p2), 1   ;;  %vm667_vm6 = vcmask (!%p798_p2), 7168   ;;  %vm669_vm7 = vcmask (!%p798_p2), 39936  }
  0x28   : > { %v336_v20 = vunpack.c.l.bf16 (!%p798_p2), %v335_v19  ;;  %v417_v21 = vunpack.c.h.bf16 (!%p798_p2), %v335_v19  ;;  %v497_v25 = vunpack.c.l.bf16 (!%p798_p2), %v804_v22  ;;  %v577_v26 = vunpack.c.h.bf16 (!%p798_p2), %v804_v22  ;;  %s1066_s10 = smov (!%p798_p2), 5   ;;  %s1067_s11 = smov (!%p798_p2), 14  }
  0x29   : > { %834 = vmatpush3.bf16.msra.mxu0 %v954_v3  ;;  %vm671_vm8 = vcmask (!%p798_p2), 113664   ;;  %vm673_vm9 = vcmask (!%p798_p2), 408576  }
  0x2a   : > { %835 = vmatprep.subr.bf16.mxu0 %v1058_v2 }
  0x2d   : > { %836 = vmatpush3.bf16.msra.mxu0 %v955_v4 }
  0x2e   : > { %837 = vmatprep.subr.bf16.mxu0 %v1058_v2 }
  0x31   : > { %838 = vmatpush3.bf16.msra.mxu0 %v956_v5 }
  0x32   : > { %839 = vmatprep.subr.bf16.mxu0 %v1058_v2 }
  0x35   : > { %840 = vmatpush3.bf16.msra.mxu0 %v957_v6 }
  0x36   : > { %841 = vmatprep.subr.bf16.mxu0 %v1058_v2 }
  0x39   : > { %842 = vmatpush3.bf16.msra.mxu0 %v958_v7 }
  0x3a   : > { %843 = vmatprep.subr.bf16.mxu0 %v1058_v2 }
  0x3d   : > { %844 = vmatpush3.bf16.msra.mxu0 %v959_v8 }
  0x3e   : > { %845 = vmatprep.subr.bf16.mxu0 %v1058_v2 }
  0x41   : > { %846 = vmatpush3.bf16.msra.mxu0 %v960_v9 }
  0x42   : > { %851 = vmatprep.subr.mxu0 (!%p798_p2), %v1061_v18 }
  0x44   : > { %848 = vmatmul.mubr.bf16.vlgmr.msra.gmra.mrb[0].mxu0 %v222_v10 }
  0x45   : > { %853 = vmatprep.mubr.msk.f32.mxu0 (!%p798_p2), %vm1063_vm5, %v1061_v18 }
 0x114   : > { %333 = sbr.rel (%p798_p2) target bundleno = 743 (0x2e7), region = 40 }
 0x117   : > { %v321_v12 = vpop.f32.mrb[0].mxu0 }
 0x118   : > { %v327_v13 = vadd.f32 %v321_v12, %v221_v11  ;;  %v849_v14 = vpop.f32.mrb[1].mxu0 }
 0x119   : > { %v324_v15 = vpop.f32.mrb[2].mxu0 }
 0x11a   : > { %329 = vst.msk [vmem:[#allocation2] sm:$0xf] %vm328_vm2, %v327_v13  ;;  %v850_v16 = vpop.f32.mrb[3].mxu0 }
 0x121   : > { %v334_v17 = vld [vmem:[#allocation2] sm:$0xf] }
 0x122   : > { %418 = vrot.lane.b32.xlu0 %v334_v17, %s1060_s4  ;;  %578 = vrot.lane.b32.xlu1 %v334_v17, %s1062_s6 }
 0x123   : > { %852 = vmatpush3.msk.msra.mxu0 %vm341_vm3, %v334_v17 }
 0x124   : > { %854 = vmatmul.mubr.msk.f32.vlgmr.msra.gmra.mrb[0].mxu0 %vm337_vm4, %v336_v20  ;;  %861 = vmatprep.subr.mxu0 %v1061_v18 }
 0x125   : > { %863 = vmatprep.mubr.msk.f32.mxu0 %vm1063_vm5, %v1061_v18 }
 0x126   : > { %498 = vrot.lane.b32.xlu0 %v334_v17, %s1064_s15 }
 0x194   : > { %v419_v23 = vpop.permute.xlu0 %418  ;;  %v579_v24 = vpop.permute.xlu1 %578 }
 0x195   : > { %857 = vmatpush3.msk.msra.mxu1 %vm341_vm3, %v419_v23 }
 0x196   : > { %859 = vmatmul.mubr.msk.f32.vlgmr.msra.gmra.mrb[0].mxu1 %vm337_vm4, %v417_v21  ;;  %866 = vmatprep.subr.mxu1 %v1061_v18 }
 0x197   : > { %867 = vmatpush3.msk.msra.mxu1 %vm341_vm3, %v579_v24  ;;  %868 = vmatprep.mubr.msk.f32.mxu1 %vm1063_vm5, %v1061_v18 }
 0x198   : > { %v499_v27 = vpop.permute.xlu0 %498 }
 0x199   : > { %862 = vmatpush3.msk.msra.mxu0 %vm341_vm3, %v499_v27 }
 0x19a   : > { %864 = vmatmul.mubr.msk.f32.vlgmr.msra.gmra.mrb[2].mxu0 %vm337_vm4, %v497_v25  ;;  %869 = vmatmul.mubr.msk.f32.vlgmr.msra.gmra.mrb[2].mxu1 %vm337_vm4, %v577_v26 }
 0x1f7   : > { %v411_v28 = vpop.f32.mrb[0].mxu0 }
 0x1f8   : > { %v855_v29 = vpop.f32.mrb[1].mxu0 }
 0x269   : > { %v491_v30 = vpop.f32.mrb[0].mxu1 }
 0x26a   : > { %656 = vrot.lane.b32.xlu1 %v491_v30, %s1065_s9  ;;  %v860_v31 = vpop.f32.mrb[1].mxu1 }
 0x26d   : > { %v571_v32 = vpop.f32.mrb[2].mxu0  ;;  %v651_v33 = vpop.f32.mrb[2].mxu1 }
 0x26e   : > { %660 = vrot.lane.b32.xlu0 %v571_v32, %s1066_s10  ;;  %664 = vrot.lane.b32.xlu1 %v651_v33, %s1067_s11  ;;  %v865_v34 = vpop.f32.mrb[3].mxu0  ;;  %v870_v35 = vpop.f32.mrb[3].mxu1 }
 0x2dc   : > { %v657_v36 = vpop.permute.xlu1 %656 }
 0x2dd   : > { %v668_v37 = vsel %vm667_vm6, %v411_v28, %v657_v36 }
 0x2e0   : > { %v661_v38 = vpop.permute.xlu0 %660  ;;  %v665_v39 = vpop.permute.xlu1 %664 }
 0x2e1   : > { %v670_v40 = vsel %vm669_vm7, %v668_v37, %v661_v38 }
 0x2e2   : > { %v672_v41 = vsel %vm671_vm8, %v670_v40, %v665_v39 }
 0x2e3   : > { %v674_v42 = vsel %vm673_vm9, %v672_v41, 0.0 }
 0x2e4   : > { %v675_v43 = vpack.c.bf16 %v674_v42, %v674_v42 }
 0x2e6   : > { %676 = vst.msk [vmem:[%s199_s23] sm:$0xf] %vm328_vm2, %v675_v43 }
 0x2e7 PF: > { %s811_s20 = sshll.u32 %s1043_s16, 6  ;;  %s691_s4 = sshll.u32 %s199_s23, 4  ;;  %s692_s4 = int_to_ptr.vmem [resolvable:$true] %s691_s4 }
 0x2e8   : > { %s1216_s27 = scalar_lea.hbm %s1270_s3, %s811_s20  ;;  %s1276_s29 = sand.u32 1, %s1031_s13  }
 0x2e9   : > { %s678_s5 = scalar_lea.sflag [#allocation4], %s1276_s29  ;;  %s961_s6 = scalar_lea.vmem %s692_s4, 64 }
 0x2ea   : > { %p962_p4 = scmp.ne.s32.totalorder %s692_s4, %s961_s6  ;;  %s1068_s15 = smov [#allocation3]  }
 0x2eb   : > { %s965_s7 = sshll.u32 %s1068_s15, 4  ;;  %s966_s7 = int_to_ptr.vmem [resolvable:$false] %s965_s7 }
 0x2ec   : > { %p963_p5 = pnand %p962_p4, %p1138_p3  ;;  %s967_s8 = scalar_lea.vmem %s966_s7, 128 }
 0x2ed   : > { %p968_p7 = scmp.lt.s32.totalorder %s692_s4, %s966_s7  ;;  %p969_p8 = scmp.lt.s32.totalorder %s967_s8, %s961_s6 }
 0x2ee   : > { %p964_p6 = pneg %p963_p5 }
 0x2ef   : > { %p970_p10 = por %p969_p8, %p968_p7 }
 0x2f1   : > { %p971_p11 = pnand %p970_p10, %p964_p6 }
 0x2f3   : > { %974 = shalt.err (!%p971_p11)
}
 0x2f4   : > { %s975_s16 = scalar_lea.hbm %s1216_s27, 64  ;;  %s979_s9 = scalar_lea.hbm %s1270_s3, 128 }
 0x2f5   : > { %p976_p12 = scmp.ne.s32.totalorder %s1216_s27, %s975_s16  ;;  %p980_p1 = scmp.lt.u32.totalorder %s1216_s27, %s1270_s3 }
 0x2f6   : > { %p981_p2 = scmp.lt.u32.totalorder %s979_s9, %s975_s16  ;;  %p983_p5 = scmp.lt.u32.totalorder %s975_s16, %s1216_s27 }
 0x2f7   : > { %p977_p13 = pnand %p976_p12, %p1138_p3 }
 0x2f8   : > { %p982_p4 = por %p981_p2, %p980_p1 }
 0x2f9   : > { %p978_p0 = pneg %p977_p13 }
 0x2fa   : > { %p984_p6 = por %p983_p5, %p982_p4 }
 0x2fc   : > { %p985_p7 = pnand %p984_p6, %p978_p0 }
 0x2fe   : > { %988 = shalt.err (!%p985_p7)
}
 0x2ff   : > { %871 = dma.vmem_to_hbm [thread:$0]  (%p1138_p3), %s692_s4, 64, %s1216_s27, %s678_s5  }
 0x300 PF: > { %p877_p8 = scmp.ge.s32.totalorder %s1055_s19, 2  ;;  %s703_s20 = sand.u32 1, %s1027_s12  }
 0x301   : > { %s704_s21 = scalar_lea.sflag [#allocation4], %s703_s20 }
 0x302   : > { %p874_p10 = pnand %p877_p8, %p1148_p9 }
 0x304   : > { %1022 = dma.done.wait (!%p874_p10), %s704_s21, 64  }
 0x305   : > { %1024 = vsyncadd (!%p874_p10), %s704_s21, 4294967232  ;;  %s16_s19 = sadd.s32 1, %s1055_s19   ;;  %s1277_s24 = sld [smem:[#allocation6_spill]] }
 0x306   : > { %p13_p11 = scmp.ge.s32.totalorder %s16_s19, 6   ;;  %s1278_s12 = smov %s1031_s13 }
 0x307   : > { %s1279_s13 = smov %s1035_s14  ;;  %s1280_s14 = smov %s1156_s28 }
 0x308   : > { %s1281_s15 = smov %s1047_s17  ;;  %s1282_s16 = smov %s1051_s18 }
 0x309   : > { %s1283_s17 = smov %s1286_s22  ;;  %15 = sbr.rel (!%p13_p11) target bundleno = 5 (0x5), region = 81 }
 0x30b   : > { %s1284_s18 = smov %s1277_s24 }
 0x310   :  { %709 = vsyncpa [#allocation4], 1 }
 0x311   :  { %711 = vsyncpa [#allocation4 + $0x1], 1 }

</bundles_post_ra>
